<compile_context>
chip_gen: v7x
topology: tpu7x:2x2x1
jax: 0.10.0
libtpu: 0.0.40
codegen_flags: <defaults>
</compile_context>

<pallas_src>
import functools

import jax
import jax.numpy as jnp
from jax.experimental import pallas as pl
from jax.experimental.pallas import tpu as pltpu


def _value_net_kernel(x_ref, w1_ref, b1_ref, w2_ref, b2_ref, w3_ref, b3_ref,
                      out_ref):
    # fc1 + relu  (bf16 inputs, f32 accumulation on the MXU)
    h1 = jnp.dot(x_ref[...], w1_ref[...], preferred_element_type=jnp.float32)
    h1 = jnp.maximum(h1 + b1_ref[...], 0.0)
    # fc2 + relu
    h2 = jnp.dot(h1.astype(w2_ref.dtype), w2_ref[...],
                 preferred_element_type=jnp.float32)
    h2 = jnp.maximum(h2 + b2_ref[...], 0.0)
    # fc3 (out_features=1): VPU multiply + lane reduction instead of an N=1 MXU
    # matmul. w3_ref is the transposed weight row, shape (1, H), f32.
    y = jnp.sum(h2 * w3_ref[...], axis=-1, keepdims=True) + b3_ref[...]
    out_ref[...] = y.astype(out_ref.dtype)


def _round_up(n, m):
    return ((n + m - 1) // m) * m


def value_network_forward(x, params, *, tile_b=512):
    """x: (B, input_dim) float32. Returns (B,) float32 (matches .squeeze())."""
    w1, b1, w2, b2, w3, b3 = params
    B, D = x.shape
    H = w1.shape[1]

    # Bandwidth-dominant streams in bf16; tiny f32 operands stay f32.
    x_bf = x.astype(jnp.bfloat16)
    w1_bf = w1.astype(jnp.bfloat16)
    w2_bf = w2.astype(jnp.bfloat16)
    w3_t = jnp.reshape(w3, (1, H)).astype(jnp.float32)  # VPU path for fc3

    # Batch tile: large (512) for real batches, shrink for tiny ones.
    tb = min(tile_b, _round_up(B, 8))
    num_tiles = pl.cdiv(B, tb)
    b_pad = num_tiles * tb
    if b_pad != B:
        x_bf = jnp.pad(x_bf, ((0, b_pad - B), (0, 0)))

    # Weights/biases: full-array blocks, constant block index -> VMEM-resident.
    def resident(a):
        return pl.BlockSpec(a.shape, lambda i: (0,) * a.ndim)

    flops = 2 * b_pad * (D * H + H * H + H)
    bytes_accessed = (
        x_bf.size * 2 + w1_bf.size * 2 + w2_bf.size * 2
        + (b1.size + b2.size + w3_t.size + b3.size) * 4
        + b_pad * 4)

    out = pl.pallas_call(
        _value_net_kernel,
        out_shape=jax.ShapeDtypeStruct((b_pad, 1), jnp.float32),
        grid_spec=pltpu.PrefetchScalarGridSpec(
            num_scalar_prefetch=0,
            grid=(num_tiles,),
            in_specs=[
                pl.BlockSpec((tb, D), lambda i: (i, 0)),   # streamed x tiles
                resident(w1_bf), resident(b1),
                resident(w2_bf), resident(b2),
                resident(w3_t), resident(b3),
            ],
            out_specs=pl.BlockSpec((tb, 1), lambda i: (i, 0)),
        ),
        compiler_params=pltpu.CompilerParams(
            dimension_semantics=("parallel",)),
        cost_estimate=pl.CostEstimate(
            flops=flops, transcendentals=0, bytes_accessed=bytes_accessed),
    )(x_bf, w1_bf, b1, w2_bf, b2, w3_t, b3)

    # PyTorch: self.fc3(x).squeeze()  ->  (B, 1) -> (B,)
    return jnp.squeeze(out[:B], axis=-1)


def init_value_network_params(key, input_dim, hidden_dim=64):
    """Deterministic init mimicking nn.Linear (uniform +/- 1/sqrt(fan_in))."""
    k1, k2, k3, k4, k5, k6 = jax.random.split(key, 6)

    def uniform(k, shape, fan_in):
        bound = 1.0 / jnp.sqrt(jnp.float32(fan_in))
        return jax.random.uniform(k, shape, jnp.float32, -bound, bound)

    # Stored as (in_features, out_features); biases as (1, out_features).
    w1 = uniform(k1, (input_dim, hidden_dim), input_dim)
    b1 = uniform(k2, (1, hidden_dim), input_dim)
    w2 = uniform(k3, (hidden_dim, hidden_dim), hidden_dim)
    b2 = uniform(k4, (1, hidden_dim), hidden_dim)
    w3 = uniform(k5, (hidden_dim, 1), hidden_dim)
    b3 = uniform(k6, (1, 1), hidden_dim)
    return (w1, b1, w2, b2, w3, b3)


def _reference_forward_f32(x, params):
    w1, b1, w2, b2, w3, b3 = params
    h = jnp.maximum(x @ w1 + b1, 0.0)
    h = jnp.maximum(h @ w2 + b2, 0.0)
    return jnp.squeeze(h @ w3 + b3, axis=-1)


def _reference_forward_bf16(x, params):
    # Mirrors the kernel's numerics (bf16 matmul inputs, f32 accumulation).
    w1, b1, w2, b2, w3, b3 = params
    xb = x.astype(jnp.bfloat16)
    h = jnp.dot(xb, w1.astype(jnp.bfloat16), preferred_element_type=jnp.float32)
    h = jnp.maximum(h + b1, 0.0)
    h = jnp.dot(h.astype(jnp.bfloat16), w2.astype(jnp.bfloat16),
                preferred_element_type=jnp.float32)
    h = jnp.maximum(h + b2, 0.0)
    y = jnp.sum(h * jnp.reshape(w3, (1, -1)), axis=-1, keepdims=True) + b3
    return jnp.squeeze(y, axis=-1)


if __name__ == "__main__":
    input_dim = 16
    hidden_dim = 64

    key = jax.random.PRNGKey(0)
    kx, kp, kx2 = jax.random.split(key, 3)
    params = init_value_network_params(kp, input_dim, hidden_dim)

    fwd = jax.jit(functools.partial(value_network_forward, tile_b=512))

    # Small batch (single tile, exercises padding-to-8).
    batch = 8
    x = jax.random.normal(kx, (batch, input_dim), dtype=jnp.float32)
    out = jax.block_until_ready(fwd(x, params))
    assert out.shape == (batch,), out.shape
    ref_bf16 = _reference_forward_bf16(x, params)
    ref_f32 = _reference_forward_f32(x, params)
    assert jnp.allclose(out, ref_bf16, atol=1e-4, rtol=1e-3), (out, ref_bf16)
    assert jnp.allclose(out, ref_f32, atol=5e-2, rtol=5e-2), (out, ref_f32)

    # Non-multiple batch (multi-tile grid, exercises streaming + slicing).
    batch2 = 600
    x2 = jax.random.normal(kx2, (batch2, input_dim), dtype=jnp.float32)
    out2 = jax.block_until_ready(fwd(x2, params))
    assert out2.shape == (batch2,), out2.shape
    ref2 = _reference_forward_bf16(x2, params)
    assert jnp.allclose(out2, ref2, atol=1e-4, rtol=1e-3)

    print("KERNEL_OK")
</pallas_src>

<mosaic_0001>
module attributes {stable_mosaic.version = 11 : i64} {
  func.func @_value_net_kernel(%arg0: i32, %arg1: memref<8x16xbf16, #tpu.memory_space<vmem>>, %arg2: memref<16x64xbf16, #tpu.memory_space<vmem>>, %arg3: memref<1x64xf32, #tpu.memory_space<vmem>>, %arg4: memref<64x64xbf16, #tpu.memory_space<vmem>>, %arg5: memref<1x64xf32, #tpu.memory_space<vmem>>, %arg6: memref<1x64xf32, #tpu.memory_space<vmem>>, %arg7: memref<1x1xf32, #tpu.memory_space<vmem>>, %arg8: memref<8x1xf32, #tpu.memory_space<vmem>>) attributes {dimension_semantics = [#tpu.dimension_semantics<parallel>], iteration_bounds = array<i64: 1>, scalar_prefetch = 0 : i64, scratch_operands = 0 : i64, tpu.core_type = #tpu.core_type<tc>, window_params = [{transform_indices = @transform_0, window_bounds = array<i64: 8, 16>}, {pipeline_mode = #tpu.pipeline_mode<synchronous>, transform_indices = @transform_1, window_bounds = array<i64: 16, 64>}, {pipeline_mode = #tpu.pipeline_mode<synchronous>, transform_indices = @transform_2, window_bounds = array<i64: 1, 64>}, {pipeline_mode = #tpu.pipeline_mode<synchronous>, transform_indices = @transform_3, window_bounds = array<i64: 64, 64>}, {pipeline_mode = #tpu.pipeline_mode<synchronous>, transform_indices = @transform_4, window_bounds = array<i64: 1, 64>}, {pipeline_mode = #tpu.pipeline_mode<synchronous>, transform_indices = @transform_5, window_bounds = array<i64: 1, 64>}, {pipeline_mode = #tpu.pipeline_mode<synchronous>, transform_indices = @transform_6, window_bounds = array<i64: 1, 1>}, {transform_indices = @transform_7, window_bounds = array<i64: 8, 1>}]} {
    %c0 = arith.constant 0 : index
    %c0_0 = arith.constant 0 : index
    %0 = vector.load %arg1[%c0, %c0_0] : memref<8x16xbf16, #tpu.memory_space<vmem>>, vector<8x16xbf16>
    %c0_1 = arith.constant 0 : index
    %c0_2 = arith.constant 0 : index
    %1 = vector.load %arg2[%c0_1, %c0_2] : memref<16x64xbf16, #tpu.memory_space<vmem>>, vector<16x64xbf16>
    %cst = arith.constant dense<0.000000e+00> : vector<8x64xf32>
    %2 = tpu.matmul %0, %1, %cst {dimension_numbers = #tpu.dot_dimension_numbers<[1], [0], [0], [1], [0, 0, 1, 1], [], []>} : vector<8x16xbf16>, vector<16x64xbf16>, vector<8x64xf32> -> vector<8x64xf32>
    %c0_3 = arith.constant 0 : index
    %c0_4 = arith.constant 0 : index
    %3 = vector.load %arg3[%c0_3, %c0_4] : memref<1x64xf32, #tpu.memory_space<vmem>>, vector<1x64xf32>
    %4 = vector.broadcast %3 : vector<1x64xf32> to vector<8x64xf32>
    %5 = arith.addf %2, %4 : vector<8x64xf32>
    %cst_5 = arith.constant 0.000000e+00 : f32
    %6 = vector.broadcast %cst_5 : f32 to vector<8x64xf32>
    %7 = arith.maximumf %5, %6 : vector<8x64xf32>
    %8 = arith.truncf %7 : vector<8x64xf32> to vector<8x64xbf16>
    %c0_6 = arith.constant 0 : index
    %c0_7 = arith.constant 0 : index
    %9 = vector.load %arg4[%c0_6, %c0_7] : memref<64x64xbf16, #tpu.memory_space<vmem>>, vector<64x64xbf16>
    %cst_8 = arith.constant dense<0.000000e+00> : vector<8x64xf32>
    %10 = tpu.matmul %8, %9, %cst_8 {dimension_numbers = #tpu.dot_dimension_numbers<[1], [0], [0], [1], [0, 0, 1, 1], [], []>} : vector<8x64xbf16>, vector<64x64xbf16>, vector<8x64xf32> -> vector<8x64xf32>
    %c0_9 = arith.constant 0 : index
    %c0_10 = arith.constant 0 : index
    %11 = vector.load %arg5[%c0_9, %c0_10] : memref<1x64xf32, #tpu.memory_space<vmem>>, vector<1x64xf32>
    %12 = vector.broadcast %11 : vector<1x64xf32> to vector<8x64xf32>
    %13 = arith.addf %10, %12 : vector<8x64xf32>
    %cst_11 = arith.constant 0.000000e+00 : f32
    %14 = vector.broadcast %cst_11 : f32 to vector<8x64xf32>
    %15 = arith.maximumf %13, %14 : vector<8x64xf32>
    %c0_12 = arith.constant 0 : index
    %c0_13 = arith.constant 0 : index
    %16 = vector.load %arg6[%c0_12, %c0_13] : memref<1x64xf32, #tpu.memory_space<vmem>>, vector<1x64xf32>
    %17 = vector.broadcast %16 : vector<1x64xf32> to vector<8x64xf32>
    %18 = arith.mulf %15, %17 : vector<8x64xf32>
    %cst_14 = arith.constant dense<0.000000e+00> : vector<8xf32>
    %19 = vector.multi_reduction <add>, %18, %cst_14 [1] : vector<8x64xf32> to vector<8xf32>
    %20 = vector.shape_cast %19 : vector<8xf32> to vector<8x1xf32>
    %c0_15 = arith.constant 0 : index
    %c0_16 = arith.constant 0 : index
    %21 = vector.load %arg7[%c0_15, %c0_16] : memref<1x1xf32, #tpu.memory_space<vmem>>, vector<1x1xf32>
    %22 = vector.broadcast %21 : vector<1x1xf32> to vector<8x1xf32>
    %23 = arith.addf %20, %22 : vector<8x1xf32>
    %c0_17 = arith.constant 0 : index
    %c0_18 = arith.constant 0 : index
    %24 = vector.load %arg8[%c0_17, %c0_18] : memref<8x1xf32, #tpu.memory_space<vmem>>, vector<8x1xf32>
    tpu.vector_store %arg8[%c0_17, %c0_18], %23 {strides = array<i32>} : memref<8x1xf32, #tpu.memory_space<vmem>>, vector<8x1xf32>,
    return
  }
  func.func @transform_0(%arg0: i32) -> (i32, i32) {
    %c0_i32 = arith.constant 0 : i32
    %c0_i32_0 = arith.constant 0 : i32
    return %arg0, %c0_i32 : i32, i32
  }
  func.func @transform_1(%arg0: i32) -> (i32, i32) {
    %c0_i32 = arith.constant 0 : i32
    %c0_i32_0 = arith.constant 0 : i32
    %c0_i32_1 = arith.constant 0 : i32
    return %c0_i32, %c0_i32_0 : i32, i32
  }
  func.func @transform_2(%arg0: i32) -> (i32, i32) {
    %c0_i32 = arith.constant 0 : i32
    %c0_i32_0 = arith.constant 0 : i32
    %c0_i32_1 = arith.constant 0 : i32
    return %c0_i32, %c0_i32_0 : i32, i32
  }
  func.func @transform_3(%arg0: i32) -> (i32, i32) {
    %c0_i32 = arith.constant 0 : i32
    %c0_i32_0 = arith.constant 0 : i32
    %c0_i32_1 = arith.constant 0 : i32
    return %c0_i32, %c0_i32_0 : i32, i32
  }
  func.func @transform_4(%arg0: i32) -> (i32, i32) {
    %c0_i32 = arith.constant 0 : i32
    %c0_i32_0 = arith.constant 0 : i32
    %c0_i32_1 = arith.constant 0 : i32
    return %c0_i32, %c0_i32_0 : i32, i32
  }
  func.func @transform_5(%arg0: i32) -> (i32, i32) {
    %c0_i32 = arith.constant 0 : i32
    %c0_i32_0 = arith.constant 0 : i32
    %c0_i32_1 = arith.constant 0 : i32
    return %c0_i32, %c0_i32_0 : i32, i32
  }
  func.func @transform_6(%arg0: i32) -> (i32, i32) {
    %c0_i32 = arith.constant 0 : i32
    %c0_i32_0 = arith.constant 0 : i32
    %c0_i32_1 = arith.constant 0 : i32
    return %c0_i32, %c0_i32_0 : i32, i32
  }
  func.func @transform_7(%arg0: i32) -> (i32, i32) {
    %c0_i32 = arith.constant 0 : i32
    %c0_i32_0 = arith.constant 0 : i32
    return %arg0, %c0_i32 : i32, i32
  }
}

</mosaic_0001>

<bundles_post_ra>
// kernel: value_network_forward.1
= control target key start
LH: loop header
LB: loop body
LE: loop exit
PB: predicated region body
PF: predicated region fallthrough
CT: control target
= control target key end

     0   :  { %v243_v0 = vmov 0.0   ;;  %vm244_vm0 = vmmov 0   ;;  %vm45_vm1 = vcmask 130048   ;;  %vm130_vm2 = vcmask 523264   ;;  %s320_s1 = inlined_call_operand.vmem [shape: bf16[16,64], index: 1, kind: input, shape index: {}]   ;;  %s321_s0 = inlined_call_operand.vmem [shape: bf16[8,16], index: 0, kind: input, shape index: {}]   ;;  %s322_s3 = inlined_call_operand.vmem [shape: bf16[64,64], index: 3, kind: input, shape index: {}]   ;;  %s323_s2 = inlined_call_operand.vmem [shape: f32[1,64], index: 2, kind: input, shape index: {}]   ;;  %s324_s6 = inlined_call_operand.<no memory space> [shape: f32[1,1], index: 6, kind: input, shape index: {}]   ;;  %s325_s4 = inlined_call_operand.vmem [shape: f32[1,64], index: 4, kind: input, shape index: {}]   ;;  %s326_s5 = inlined_call_operand.vmem [shape: f32[1,64], index: 5, kind: input, shape index: {}]   ;;  %s327_s7 = inlined_call_operand.vmem [shape: f32[8,1], index: 7, kind: output, shape index: {}]  }
   0x1   :  { %218 = vmatprep.subr.bf16.mxu0 %v243_v0  ;;  %v238_v1 = vld [vmem:[%s320_s1] sm:$0xff]   ;;  %220 = vmatprep.mubr.msk.bf16.mxu0 %vm244_vm0, %v243_v0  ;;  %v240_v4 = vld [vmem:[%s322_s3 + $0x8] sm:$0xff]   ;;  %v241_v5 = vld [vmem:[%s322_s3 + $0x10] sm:$0xff]   ;;  %v12_v15 = vstv %s324_s6  ;;  %vm194_vm3 = vcmask 7168  }
   0x2   :  { %v29_v2 = vld [vmem:[%s321_s0] sm:$0xf]  ;;  %224 = vmatprep.subr.bf16.mxu1 %v243_v0  ;;  %232 = vmatprep.mubr.msk.bf16.mxu1 %vm244_vm0, %v243_v0  ;;  %v242_v6 = vld [vmem:[%s322_s3 + $0x18] sm:$0xff]   ;;  %13 = vst [vmem:[#allocation2] sm:$0x1] %v12_v15 }
   0x3   :  { %219 = vmatpush3.bf16.msra.mxu0 %v238_v1  ;;  %v239_v3 = vld [vmem:[%s322_s3] sm:$0xff]  }
   0x4   :  { %225 = vmatpush3.bf16.msra.mxu1 %v239_v3  ;;  %v200_v7 = vld [vmem:[%s323_s2] ss:$0 sm:$0xff] }
   0x5   :  { %226 = vmatprep.subr.bf16.mxu1 %v243_v0  ;;  %v203_v16 = vld [vmem:[%s325_s4] ss:$0 sm:$0xff] }
   0x6   :  { %221 = vmatmul.mubr.msk.bf16.vlgmr.msra.gmra.mrb[0].mxu0 %vm45_vm1, %v29_v2  ;;  %v209_v21 = vld [vmem:[%s326_s5] ss:$0 sm:$0xff] }
   0x8   :  { %227 = vmatpush3.bf16.msra.mxu1 %v240_v4 }
   0x9   :  { %228 = vmatprep.subr.bf16.mxu1 %v243_v0  ;;  %v210_v26 = vld [vmem:[#allocation2] ss:$0 sm:$0xff] }
   0xc   :  { %229 = vmatpush3.bf16.msra.mxu1 %v241_v5 }
   0xd   :  { %230 = vmatprep.subr.bf16.mxu1 %v243_v0 }
  0x10   :  { %231 = vmatpush3.bf16.msra.mxu1 %v242_v6 }
  0xd9   :  { %v83_v8 = vpop.f32.mrb[0].mxu0 }
  0xda   :  { %v84_v9 = vadd.f32 %v200_v7, %v83_v8  ;;  %v222_v10 = vpop.f32.mrb[1].mxu0 }
  0xdb   :  { %v86_v11 = vpop.f32.mrb[2].mxu0 }
  0xdc   :  { %v89_v12 = vmax.f32 %v84_v9, 0.0  ;;  %v223_v13 = vpop.f32.mrb[3].mxu0 }
  0xde   :  { %v90_v14 = vpack.c.bf16 %v89_v12, %v89_v12 }
  0xe0   :  { %233 = vmatmul.mubr.msk.bf16.vlgmr.msra.gmra.mrb[0].mxu1 %vm130_vm2, %v90_v14 }
 0x1b3   :  { %v168_v17 = vpop.f32.mrb[0].mxu1 }
 0x1b4   :  { %v169_v18 = vadd.f32 %v203_v16, %v168_v17  ;;  %v234_v19 = vpop.f32.mrb[1].mxu1 }
 0x1b5   :  { %v171_v20 = vpop.f32.mrb[2].mxu1 }
 0x1b6   :  { %v174_v22 = vmax.f32 %v169_v18, 0.0  ;;  %v235_v23 = vpop.f32.mrb[3].mxu1 }
 0x1b8   :  { %v182_v24 = vmul.f32 %v209_v21, %v174_v22 }
 0x1ba   :  { %v183_v25 = vsel %vm130_vm2, %v182_v24, 0.0 }
 0x1bb   :  { %184 = vadd.xlane.f32.xlu0 %v183_v25 }
 0x248   :  { %v185_v27 = vpop.xlane.xlu0 %184 }
 0x249   :  { %v193_v28 = vadd.f32 %v210_v26, %v185_v27 }
 0x24b   :  { %195 = vst.msk [vmem:[%s327_s7] sm:$0xff] %vm194_vm3, %v193_v28 }

</bundles_post_ra>
